<compile_context>
chip_gen: v6e
topology: v6e:2x2x1
jax: 0.10.0
libtpu: 0.0.40
codegen_flags: <defaults>
</compile_context>

<pallas_src>
import functools

import jax
import jax.numpy as jnp
from jax.experimental import pallas as pl
from jax.experimental.pallas import tpu as pltpu

_LANE = 128
_VMEM_LIMIT = 48 * 1024 * 1024          # safe on v5e/v6e (128 MiB) and v7x (64 MiB)
_WHOLE_BLOCK_BUDGET = 24 * 1024 * 1024  # 2x double-buffered (in + out) per-batch slab
_CHUNK_BUDGET = 8 * 1024 * 1024         # 2x double-buffered (in + out) per HW chunk


def _round_up(x, m):
    return ((x + m - 1) // m) * m


# ---------------------------------------------------------------------------
# Path 1: one batch element per grid step, whole HW resident (single x read).
# ---------------------------------------------------------------------------
def _se_kernel_whole(x_ref, w1_ref, w2_ref, o_ref, *, inv_hw):
    # x_ref/o_ref: (1, C, HWp)   w1_ref: (C, Cr)   w2_ref: (Cr, C)
    x = x_ref[...]

    # squeeze: lane-axis sum (XLU) * precomputed 1/HW (padding lanes are zero)
    pooled = jnp.sum(x.astype(jnp.float32), axis=-1) * inv_hw          # (1, C)

    # excitation: fc1 -> relu -> fc2 -> sigmoid (tiny, once per batch)
    h = jnp.dot(pooled, w1_ref[...], preferred_element_type=jnp.float32)
    h = jnp.maximum(h, 0.0)
    y = jax.nn.sigmoid(
        jnp.dot(h, w2_ref[...], preferred_element_type=jnp.float32))   # (1, C)

    # scale: broadcast channel gate over spatial lanes
    o_ref[...] = (x.astype(jnp.float32) * y[:, :, None]).astype(o_ref.dtype)


# ---------------------------------------------------------------------------
# Path 2: two-pass streaming over HW chunks (for large C*HW slabs).
#   k in [0, num_tiles)            : accumulate channel sums of chunk k
#   k == num_tiles                 : compute the sigmoid gate once
#   k in [num_tiles, 2*num_tiles)  : write out chunk (k - num_tiles) * gate
# ---------------------------------------------------------------------------
def _se_kernel_chunked(x_ref, w1_ref, w2_ref, o_ref, sum_ref, gate_ref,
                       *, inv_hw, num_tiles):
    k = pl.program_id(1)

    @pl.when(k == 0)
    def _():
        sum_ref[...] = jnp.zeros_like(sum_ref)

    @pl.when(k < num_tiles)
    def _():
        sum_ref[...] += jnp.sum(x_ref[...].astype(jnp.float32), axis=-1)  # (1, C)

    @pl.when(k == num_tiles)
    def _():
        pooled = sum_ref[...] * inv_hw
        h = jnp.dot(pooled, w1_ref[...], preferred_element_type=jnp.float32)
        h = jnp.maximum(h, 0.0)
        gate_ref[...] = jax.nn.sigmoid(
            jnp.dot(h, w2_ref[...], preferred_element_type=jnp.float32))  # (1, C)

    @pl.when(k >= num_tiles)
    def _():
        o_ref[...] = (x_ref[...].astype(jnp.float32)
                      * gate_ref[...][:, :, None]).astype(o_ref.dtype)


def selayer_forward(x_nchw, w1_t, w2_t, *, hw_tile=None):
    """SE layer forward.  x_nchw: (B, C, H, W); w1_t: (C, C//r); w2_t: (C//r, C).

    hw_tile: optional lane-chunk size (multiple of 128) to force the streaming
    path; by default the path/tile is picked from the per-batch VMEM footprint.
    """
    B, C, H, W = x_nchw.shape
    Cin, Cr = w1_t.shape
    assert Cin == C and w2_t.shape == (Cr, C)

    HW = H * W
    dtype = x_nchw.dtype
    itemsize = jnp.dtype(dtype).itemsize
    inv_hw = 1.0 / float(HW)

    whole_hw_pad = _round_up(HW, _LANE)
    whole_slab_bytes = C * whole_hw_pad * itemsize
    use_whole = hw_tile is None and 4 * whole_slab_bytes <= _WHOLE_BLOCK_BUDGET

    if use_whole:
        hwp = whole_hw_pad
    else:
        if hw_tile is None:
            hw_tile = max(_LANE,
                          (_CHUNK_BUDGET // (4 * C * itemsize)) // _LANE * _LANE)
        assert hw_tile % _LANE == 0, "hw_tile must be a multiple of 128"
        hw_tile = min(hw_tile, whole_hw_pad)
        hwp = _round_up(HW, hw_tile)
        num_tiles = hwp // hw_tile

    x_flat = x_nchw.reshape(B, C, HW)
    if hwp != HW:
        # zero padding keeps the channel sums (and hence the mean) exact
        x_flat = jnp.pad(x_flat, ((0, 0), (0, 0), (0, hwp - HW)))

    if use_whole:
        out_flat = pl.pallas_call(
            functools.partial(_se_kernel_whole, inv_hw=inv_hw),
            out_shape=jax.ShapeDtypeStruct((B, C, hwp), dtype),
            grid=(B,),
            in_specs=[
                pl.BlockSpec((1, C, hwp), lambda b: (b, 0, 0)),
                pl.BlockSpec((C, Cr), lambda b: (0, 0)),
                pl.BlockSpec((Cr, C), lambda b: (0, 0)),
            ],
            out_specs=pl.BlockSpec((1, C, hwp), lambda b: (b, 0, 0)),
            compiler_params=pltpu.CompilerParams(
                dimension_semantics=("parallel",),
                vmem_limit_bytes=_VMEM_LIMIT),
        )(x_flat, w1_t, w2_t)
    else:
        out_flat = pl.pallas_call(
            functools.partial(_se_kernel_chunked, inv_hw=inv_hw,
                              num_tiles=num_tiles),
            out_shape=jax.ShapeDtypeStruct((B, C, hwp), dtype),
            grid=(B, 2 * num_tiles),
            in_specs=[
                pl.BlockSpec((1, C, hw_tile),
                             lambda b, k: (b, 0, k % num_tiles)),
                pl.BlockSpec((C, Cr), lambda b, k: (0, 0)),
                pl.BlockSpec((Cr, C), lambda b, k: (0, 0)),
            ],
            out_specs=pl.BlockSpec(
                (1, C, hw_tile),
                lambda b, k: (b, 0, jnp.maximum(k - num_tiles, 0))),
            scratch_shapes=[
                pltpu.VMEM((1, C), jnp.float32),   # running channel sum
                pltpu.VMEM((1, C), jnp.float32),   # sigmoid gate
            ],
            compiler_params=pltpu.CompilerParams(
                dimension_semantics=("parallel", "arbitrary"),
                vmem_limit_bytes=_VMEM_LIMIT),
        )(x_flat, w1_t, w2_t)

    return out_flat[:, :, :HW].reshape(B, C, H, W)


def _reference(x, w1_t, w2_t):
    y = jnp.mean(x, axis=(2, 3))
    y = jnp.maximum(y @ w1_t, 0.0)
    y = jax.nn.sigmoid(y @ w2_t)
    return x * y[:, :, None, None]


if __name__ == "__main__":
    # small shapes consistent with the module: channel=64, reduction=16
    B, C, H, W = 2, 64, 8, 8
    reduction = 16
    Cr = C // reduction

    key = jax.random.PRNGKey(0)
    kx, k1, k2, kx2 = jax.random.split(key, 4)

    x = jax.random.normal(kx, (B, C, H, W), dtype=jnp.float32)
    w1_t = jax.random.normal(k1, (C, Cr), dtype=jnp.float32) / jnp.sqrt(C)
    w2_t = jax.random.normal(k2, (Cr, C), dtype=jnp.float32) / jnp.sqrt(Cr)

    ref = _reference(x, w1_t, w2_t)

    # Path 1: per-batch whole-HW block (default for small spatial extents).
    out = jax.block_until_ready(selayer_forward(x, w1_t, w2_t))
    assert out.shape == (B, C, H, W)
    assert jnp.allclose(out, ref, atol=1e-5, rtol=1e-5)

    # Path 2: forced two-pass streaming kernel (the large-C*HW code path),
    # exercised at a small shape with num_tiles == 1 and num_tiles == 2.
    out_chunked = jax.block_until_ready(
        selayer_forward(x, w1_t, w2_t, hw_tile=128))
    assert jnp.allclose(out_chunked, ref, atol=1e-5, rtol=1e-5)

    x2 = jax.random.normal(kx2, (B, C, 16, 16), dtype=jnp.float32)  # HW=256
    ref2 = _reference(x2, w1_t, w2_t)
    out2 = jax.block_until_ready(selayer_forward(x2, w1_t, w2_t, hw_tile=128))
    assert jnp.allclose(out2, ref2, atol=1e-5, rtol=1e-5)

    print("KERNEL_OK")
</pallas_src>

<mosaic_0001>
module attributes {stable_mosaic.version = 11 : i64} {
  func.func @_se_kernel_whole(%arg0: i32, %arg1: memref<1x64x128xf32, #tpu.memory_space<vmem>>, %arg2: memref<64x4xf32, #tpu.memory_space<vmem>>, %arg3: memref<4x64xf32, #tpu.memory_space<vmem>>, %arg4: memref<1x64x128xf32, #tpu.memory_space<vmem>>) attributes {dimension_semantics = [#tpu.dimension_semantics<parallel>], iteration_bounds = array<i64: 2>, scalar_prefetch = 0 : i64, scratch_operands = 0 : i64, tpu.core_type = #tpu.core_type<tc>, window_params = [{transform_indices = @transform_0, window_bounds = array<i64: 1, 64, 128>}, {pipeline_mode = #tpu.pipeline_mode<synchronous>, transform_indices = @transform_1, window_bounds = array<i64: 64, 4>}, {pipeline_mode = #tpu.pipeline_mode<synchronous>, transform_indices = @transform_2, window_bounds = array<i64: 4, 64>}, {transform_indices = @transform_3, window_bounds = array<i64: 1, 64, 128>}]} {
    %c0 = arith.constant 0 : index
    %c0_0 = arith.constant 0 : index
    %c0_1 = arith.constant 0 : index
    %0 = vector.load %arg1[%c0, %c0_0, %c0_1] : memref<1x64x128xf32, #tpu.memory_space<vmem>>, vector<1x64x128xf32>
    %cst = arith.constant dense<0.000000e+00> : vector<1x64xf32>
    %1 = vector.multi_reduction <add>, %0, %cst [2] : vector<1x64x128xf32> to vector<1x64xf32>
    %cst_2 = arith.constant 1.562500e-02 : f32
    %2 = vector.broadcast %cst_2 : f32 to vector<1x64xf32>
    %3 = arith.mulf %1, %2 : vector<1x64xf32>
    %c0_3 = arith.constant 0 : index
    %c0_4 = arith.constant 0 : index
    %4 = vector.load %arg2[%c0_3, %c0_4] : memref<64x4xf32, #tpu.memory_space<vmem>>, vector<64x4xf32>
    %cst_5 = arith.constant dense<0.000000e+00> : vector<1x4xf32>
    %5 = tpu.matmul %3, %4, %cst_5 {dimension_numbers = #tpu.dot_dimension_numbers<[1], [0], [0], [1], [0, 0, 1, 1], [], []>} : vector<1x64xf32>, vector<64x4xf32>, vector<1x4xf32> -> vector<1x4xf32>
    %cst_6 = arith.constant 0.000000e+00 : f32
    %6 = vector.broadcast %cst_6 : f32 to vector<1x4xf32>
    %7 = arith.maximumf %5, %6 : vector<1x4xf32>
    %c0_7 = arith.constant 0 : index
    %c0_8 = arith.constant 0 : index
    %8 = vector.load %arg3[%c0_7, %c0_8] : memref<4x64xf32, #tpu.memory_space<vmem>>, vector<4x64xf32>
    %cst_9 = arith.constant dense<0.000000e+00> : vector<1x64xf32>
    %9 = tpu.matmul %7, %8, %cst_9 {dimension_numbers = #tpu.dot_dimension_numbers<[1], [0], [0], [1], [0, 0, 1, 1], [], []>} : vector<1x4xf32>, vector<4x64xf32>, vector<1x64xf32> -> vector<1x64xf32>
    %10 = arith.negf %9 : vector<1x64xf32>
    %11 = math.exp %10 : vector<1x64xf32>
    %cst_10 = arith.constant 1.000000e+00 : f32
    %12 = vector.broadcast %cst_10 : f32 to vector<1x64xf32>
    %13 = arith.addf %12, %11 : vector<1x64xf32>
    %14 = arith.divf %12, %13 : vector<1x64xf32>
    %15 = vector.shape_cast %14 : vector<1x64xf32> to vector<1x64x1xf32>
    %16 = vector.broadcast %15 : vector<1x64x1xf32> to vector<1x64x128xf32>
    %17 = arith.mulf %0, %16 : vector<1x64x128xf32>
    %c0_11 = arith.constant 0 : index
    %c0_12 = arith.constant 0 : index
    %c0_13 = arith.constant 0 : index
    %18 = vector.load %arg4[%c0_11, %c0_12, %c0_13] : memref<1x64x128xf32, #tpu.memory_space<vmem>>, vector<1x64x128xf32>
    tpu.vector_store %arg4[%c0_11, %c0_12, %c0_13], %17 {strides = array<i32>} : memref<1x64x128xf32, #tpu.memory_space<vmem>>, vector<1x64x128xf32>,
    return
  }
  func.func @transform_0(%arg0: i32) -> (i32, i32, i32) {
    %c0_i32 = arith.constant 0 : i32
    %c0_i32_0 = arith.constant 0 : i32
    %c0_i32_1 = arith.constant 0 : i32
    return %arg0, %c0_i32, %c0_i32_0 : i32, i32, i32
  }
  func.func @transform_1(%arg0: i32) -> (i32, i32) {
    %c0_i32 = arith.constant 0 : i32
    %c0_i32_0 = arith.constant 0 : i32
    %c0_i32_1 = arith.constant 0 : i32
    return %c0_i32, %c0_i32_0 : i32, i32
  }
  func.func @transform_2(%arg0: i32) -> (i32, i32) {
    %c0_i32 = arith.constant 0 : i32
    %c0_i32_0 = arith.constant 0 : i32
    %c0_i32_1 = arith.constant 0 : i32
    return %c0_i32, %c0_i32_0 : i32, i32
  }
  func.func @transform_3(%arg0: i32) -> (i32, i32, i32) {
    %c0_i32 = arith.constant 0 : i32
    %c0_i32_0 = arith.constant 0 : i32
    %c0_i32_1 = arith.constant 0 : i32
    return %arg0, %c0_i32, %c0_i32_0 : i32, i32, i32
  }
}

</mosaic_0001>

<bundles_post_ra>
// kernel: tpu_custom_call.1
= control target key start
LH: loop header
LB: loop body
LE: loop exit
PB: predicated region body
PF: predicated region fallthrough
CT: control target
= control target key end

     0   :  { %8 = vsyncpa [#allocation3], 0  ;;  %s1050_s0 = inlined_call_operand.hbm [shape: f32[2,64,128], index: 0, kind: input, shape index: {}]   ;;  %s1051_s1 = inlined_call_operand.vmem [shape: f32[64,4], index: 1, kind: input, shape index: {}]   ;;  %s1052_s2 = inlined_call_operand.vmem [shape: f32[4,64], index: 2, kind: input, shape index: {}]   ;;  %s1053_s3 = inlined_call_operand.hbm [shape: f32[2,64,128], index: 3, kind: output, shape index: {}]  }
   0x1   :  { %10 = vsyncpa [#allocation3 + $0x1], 0 }
   0x2   :  { %11 = vsyncpa [#allocation4], 0 }
   0x3   :  { %13 = vsyncpa [#allocation4 + $0x1], 0  ;;  %s822_s12 = smov 0   ;;  %s824_s13 = smov 0  }
   0x4   :  { %s826_s14 = smov 0   ;;  %s828_s15 = smov 0  }
   0x5 LB: > { %s843_s16 = sadd.s32 4294967295, %s792_s15   ;;  %s589_s17 = sadd.s32 4294967294, %s792_s15   ;;  %s792_s15 = sphi %s828_s15, %s1068_s15   ;;  %s788_s14 = sphi %s826_s14, %s1067_s14   ;;  %s784_s13 = sphi %s824_s13, %s1066_s13   ;;  %s780_s12 = sphi %s822_s12, %s1065_s12  }
   0x6   : > { %s847_s18 = sadd.s32 1, %s792_s15   ;;  %s26_s19 = sadd.s32 1, %s788_s14 }
   0x7   : > { %s23_s20 = ssub.s32 %s792_s15, %s847_s18  ;;  %p33_p0 = scmp.ne.s32.totalorder %s788_s14, %s784_s13 }
   0x8   : > { %p24_p1 = scmp.eq.s32.totalorder %s23_s20, 0  ;;  %p34_p2 = scmp.eq.s32.totalorder %s792_s15, 0 }
   0x9   : > { %p39_p3 = scmp.ne.s32.totalorder %s784_s13, %s780_s12  ;;  %p40_p4 = scmp.eq.s32.totalorder %s843_s16, 0 }
   0xa   : > { %s859_s21 = scalar_select %p24_p1, %s788_s14, %s26_s19  }
   0xb   : > { %p861_p5 = por %p34_p2, %p33_p0  ;;  %p865_p6 = por %p40_p4, %p39_p3 }
   0xc   : > { %p105_p7 = scmp.eq.s32.totalorder %s843_s16, 1  ;;  %p111_p8 = scmp.eq.s32.totalorder %s589_s17, 1 }
   0xd   : > { %s1057_s23 = scalar_select %p865_p6, 1, 0 }
   0xe   : > { %p656_p10 = scmp.lt.s32.totalorder %s792_s15, 2  ;;  %p872_p11 = por %p105_p7, %p33_p0 }
   0xf   : > { %p876_p12 = por %p111_p8, %p39_p3  ;;  %s137_s26 = sand.u32 1, %s788_s14  }
  0x10   : > { %s1058_s24 = scalar_select %p872_p11, 1, 0 }
  0x11   : > { %s1059_s25 = scalar_select %p876_p12, 1, 0 }
  0x12   : > { %s607_s27 = sshll.u32 %s792_s15, 10  ;;  %s592_s28 = sshll.u32 %s137_s26, 6 }
  0x13   : > { %s885_s4 = scalar_lea.hbm %s1050_s0, %s607_s27  ;;  %s141_s5 = scalar_lea.vmem [#allocation2], %s592_s28 }
  0x14   : > { %s148_s6 = sshll.u32 %s141_s5, 4  ;;  %p889_p13 = pnand %p656_p10, %p861_p5  ;;  %s893_s6 = int_to_ptr.vmem [resolvable:$true] %s148_s6 }
  0x15   : > { %s895_s8 = scalar_lea.sflag [#allocation3], %s137_s26  ;;  %s700_s9 = scalar_lea.hbm %s885_s4, 1024 }
  0x16   : > { %p701_p0 = scmp.ne.s32.totalorder %s885_s4, %s700_s9  ;;  %p702_p1 = pneg %p889_p13 }
  0x17   : > { %s705_s17 = scalar_lea.hbm %s1050_s0, 2048  ;;  %p706_p4 = scmp.lt.s32.totalorder %s885_s4, %s1050_s0 }
  0x18   : > { %p703_p2 = pnand %p702_p1, %p701_p0  ;;  %p707_p5 = scmp.lt.s32.totalorder %s705_s17, %s700_s9 }
  0x1a   : > { %p704_p3 = pneg %p703_p2  ;;  %p708_p7 = por %p707_p5, %p706_p4 }
  0x1c   : > { %p709_p8 = pnand %p708_p7, %p704_p3 }
  0x1e   : > { %712 = shalt.err (!%p709_p8)
}
  0x1f   : > { %s713_s22 = scalar_lea.vmem %s893_s6, 1024  ;;  %s794_s26 = smov [#allocation2]  }
  0x20   : > { %p714_p10 = scmp.ne.s32.totalorder %s893_s6, %s713_s22  ;;  %s718_s27 = sshll.u32 %s794_s26, 4  ;;  %s719_s27 = int_to_ptr.vmem [resolvable:$false] %s718_s27 }
  0x21   : > { %s720_s28 = scalar_lea.vmem %s719_s27, 2048  ;;  %p721_p2 = scmp.lt.s32.totalorder %s893_s6, %s719_s27 }
  0x22   : > { %p716_p9 = pnand %p714_p10, %p702_p1  ;;  %p722_p12 = scmp.lt.s32.totalorder %s720_s28, %s713_s22 }
  0x24   : > { %p717_p0 = pneg %p716_p9  ;;  %p723_p11 = por %p722_p12, %p721_p2 }
  0x26   : > { %p724_p6 = pnand %p723_p11, %p717_p0 }
  0x28   : > { %727 = shalt.err (!%p724_p6)
}
  0x29   : > { %s795_s29 = smov 128   ;;  %s796_s30 = smov 8  }
  0x2a   : > { %651 = dma.hbm_to_vmem [thread:$0]  (!%p889_p13), %s885_s4, 1024, %s893_s6, %s895_s8, %s795_s29, %s795_s29, %s796_s30  }
  0x2b   : > { %p595_p9 = scmp.ge.s32.totalorder %s792_s15, 1  ;;  %p156_p1 = scmp.lt.s32.totalorder %s792_s15, 3 }
  0x2d   : > { %p157_p3 = pnand %p595_p9, %p156_p1 }
  0x2e   : > { %s919_s5 = sand.u32 (!%p157_p3), 1, %s784_s13   ;;  %p1061_p6 = scmp.ne.s32.totalorder (!%p157_p3), %s1057_s23, 0 }
  0x2f   : > { %160 = sbr.rel (%p157_p3) target bundleno = 779 (0x30b), region = 32  ;;  %s596_s9 = sshll.u32 (!%p157_p3), %s919_s5, 6 }
  0x30   : > { %s163_s10 = scalar_lea.sflag (!%p157_p3), [#allocation3], %s919_s5  ;;  %s166_s11 = scalar_lea.vmem (!%p157_p3), [#allocation2], %s596_s9 }
  0x34   : > { %771 = dma.done.wait (%p1061_p6), %s163_s10, 1024  }
  0x35   : > { %773 = vsyncadd (%p1061_p6), %s163_s10, 4294966272  ;;  %v929_v0 = vld [vmem:[%s166_s11] sm:$0xff]  ;;  %v931_v1 = vld [vmem:[%s166_s11 + $0x10] sm:$0xff]  ;;  %v797_v9 = vmov 0.0   ;;  %vm798_vm0 = vmmov 0   ;;  %v237_v17 = vlaneseq  ;;  %vm248_vm1 = vcmask 130112  }
  0x36   : > { %197 = vadd.xlane.f32.xlu0 %v929_v0  ;;  %201 = vadd.xlane.f32.xlu1 %v931_v1  ;;  %v935_v2 = vld [vmem:[%s166_s11 + $0x8] sm:$0xff]  ;;  %v937_v3 = vld [vmem:[%s166_s11 + $0x18] sm:$0xff]  ;;  %v941_v4 = vld [vmem:[%s166_s11 + $0x20] sm:$0xff]  ;;  %vm255_vm2 = vcmask 195712   ;;  %vm262_vm3 = vcmask 261312   ;;  %vm269_vm4 = vcmask 326912  }
  0x37   : > { %v943_v5 = vld [vmem:[%s166_s11 + $0x28] sm:$0xff]  ;;  %v947_v6 = vld [vmem:[%s166_s11 + $0x30] sm:$0xff]  ;;  %v949_v7 = vld [vmem:[%s166_s11 + $0x38] sm:$0xff]  ;;  %620 = vmatprep.subr.mxu0 %v797_v9  ;;  %639 = vmatprep.subr.mxu1 %v797_v9  ;;  %v238_v18 = vand.u32 127, %v237_v17  ;;  %v977_v19 = vshrl.u32 %v237_v17, 7  ;;  %vm276_vm5 = vcmask 392512  }
  0x38   : > { %v228_v8 = vld [vmem:[%s1051_s1 + $0x38] sm:$0xff]  ;;  %v227_v10 = vld [vmem:[%s1051_s1 + $0x30] sm:$0xff]  ;;  %v226_v11 = vld [vmem:[%s1051_s1 + $0x28] sm:$0xff]  ;;  %636 = vmatprep.mubr.msk.f32.mxu0 %vm798_vm0, %v797_v9  ;;  %641 = vmatprep.mubr.msk.f32.mxu1 %vm798_vm0, %v797_v9  ;;  %vm283_vm6 = vcmask 458112   ;;  %vm290_vm7 = vcmask 523712   ;;  %vm292_vm8 = vcmask 523264  }
  0x39   : > { %621 = vmatpush3.msra.mxu0 %v228_v8  ;;  %v225_v12 = vld [vmem:[%s1051_s1 + $0x20] sm:$0xff]  ;;  %v224_v13 = vld [vmem:[%s1051_s1 + $0x18] sm:$0xff]  ;;  %v223_v14 = vld [vmem:[%s1051_s1 + $0x10] sm:$0xff]  ;;  %v243_v20 = vadd.s32 4294967288, %v238_v18  ;;  %v257_v21 = vadd.s32 4294967272, %v238_v18  ;;  %v250_v23 = vadd.s32 4294967280, %v238_v18  ;;  %v241_v26 = vsub.s32 %v238_v18, %v977_v19 }
  0x3a   : > { %199 = vadd.xlane.f32.xlu0 %v935_v2  ;;  %203 = vadd.xlane.f32.xlu1 %v937_v3  ;;  %v222_v15 = vld [vmem:[%s1051_s1 + $0x8] sm:$0xff]  ;;  %v221_v16 = vld [vmem:[%s1051_s1] sm:$0xff]  ;;  %v264_v25 = vadd.s32 4294967264, %v238_v18  ;;  %v271_v34 = vadd.s32 4294967256, %v238_v18  ;;  %v278_v38 = vadd.s32 4294967248, %v238_v18  ;;  %v285_v42 = vadd.s32 4294967240, %v238_v18 }
  0x3b   : > { %622 = vmatprep.subr.mxu0 %v797_v9  ;;  %v246_v28 = vsub.s32 %v243_v20, %v977_v19  ;;  %v260_v29 = vsub.s32 %v257_v21, %v977_v19  ;;  %v253_v30 = vsub.s32 %v250_v23, %v977_v19  ;;  %vm371_vm9 = vcmask 1043456   ;;  %s188_s6 = scalar_lea.vmem [#allocation5], %s596_s9  ;;  %s608_s7 = sshll.u32 %s843_s16, 10 }
  0x3c   : > { %623 = vmatpush3.msra.mxu0 %v227_v10  ;;  %v267_v37 = vsub.s32 %v264_v25, %v977_v19  ;;  %v274_v45 = vsub.s32 %v271_v34, %v977_v19  ;;  %v281_v53 = vsub.s32 %v278_v38, %v977_v19  ;;  %v288_v54 = vsub.s32 %v285_v42, %v977_v19  ;;  %v366_v10 = vld [vmem:[%s1052_s2] sm:$0xf]  ;;  %s516_s9 = sshll.u32 %s188_s6, 4  ;;  %s1006_s19 = scalar_lea.hbm %s1053_s3, %s608_s7  ;;  %s1001_s9 = int_to_ptr.vmem [resolvable:$true] %s516_s9 }
  0x3d   : > { %624 = vmatprep.subr.mxu0 %v797_v9  ;;  %640 = vmatpush3.msk.msra.mxu1 %vm371_vm9, %v366_v10  ;;  %vm367_vm10 = vcmask 31744   ;;  %v453_v20 = vsub.s32 0, %v977_v19  ;;  %s503_s20 = scalar_lea.sflag [#allocation4], %s919_s5  ;;  %s728_s22 = scalar_lea.vmem %s1001_s9, 1024 }
  0x3e   : > { %205 = vadd.xlane.f32.xlu0 %v941_v4  ;;  %207 = vadd.xlane.f32.xlu1 %v943_v5  ;;  %p729_p11 = scmp.ne.s32.totalorder %s1001_s9, %s728_s22  ;;  %p1062_p12 = scmp.ne.s32.totalorder %s1058_s24, 0 }
  0x3f   : > { %625 = vmatpush3.msra.mxu0 %v226_v11  ;;  %s799_s16 = smov [#allocation5]  }
  0x40   : > { %626 = vmatprep.subr.mxu0 %v797_v9  ;;  %p730_p13 = pnand %p729_p11, %p1062_p12  ;;  %s732_s26 = sshll.u32 %s799_s16, 4  ;;  %s733_s26 = int_to_ptr.vmem [resolvable:$false] %s732_s26 }
  0x41   : > { %627 = vmatpush3.msra.mxu0 %v225_v12  ;;  %s734_s27 = scalar_lea.vmem %s733_s26, 2048  ;;  %p735_p5 = scmp.lt.s32.totalorder %s1001_s9, %s733_s26 }
  0x42   : > { %209 = vadd.xlane.f32.xlu0 %v947_v6  ;;  %211 = vadd.xlane.f32.xlu1 %v949_v7  ;;  %p731_p4 = pneg %p730_p13  ;;  %p736_p7 = scmp.lt.s32.totalorder %s734_s27, %s728_s22 }
  0x43   : > { %628 = vmatprep.subr.mxu0 %v797_v9 }
  0x44   : > { %629 = vmatpush3.msra.mxu0 %v224_v13  ;;  %p737_p8 = por %p736_p7, %p735_p5 }
  0x45   : > { %630 = vmatprep.subr.mxu0 %v797_v9 }
  0x46   : > { %631 = vmatpush3.msra.mxu0 %v223_v14  ;;  %p738_p10 = pnand %p737_p8, %p731_p4 }
  0x47   : > { %632 = vmatprep.subr.mxu0 %v797_v9 }
  0x48   : > { %633 = vmatpush3.msra.mxu0 %v222_v15 }
  0x49   : > { %634 = vmatprep.subr.mxu0 %v797_v9 }
  0x4a   : > { %635 = vmatpush3.msra.mxu0 %v221_v16 }
  0xbf   : > { %v198_v22 = vpop.xlane.xlu0 %197  ;;  %v202_v24 = vpop.xlane.xlu1 %201 }
  0xc0   : > { %v213_v27 = vmul.f32 0.015625, %v198_v22  ;;  %v215_v31 = vmul.f32 0.015625, %v202_v24 }
  0xc2   : > { %v242_v39 = vrot.slane %v213_v27, %v241_v26  ;;  %v254_v43 = vrot.slane %v215_v31, %v253_v30 }
  0xc3   : > { %v200_v32 = vpop.xlane.xlu0 %199  ;;  %v204_v33 = vpop.xlane.xlu1 %203 }
  0xc4   : > { %v214_v35 = vmul.f32 0.015625, %v200_v32  ;;  %v216_v36 = vmul.f32 0.015625, %v204_v33 }
  0xc6   : > { %v247_v40 = vrot.slane %v214_v35, %v246_v28  ;;  %v261_v41 = vrot.slane %v216_v36, %v260_v29 }
  0xc7   : > { %v206_v44 = vpop.xlane.xlu0 %205  ;;  %v208_v46 = vpop.xlane.xlu1 %207 }
  0xc8   : > { %v249_v47 = vsel %vm248_vm1, %v247_v40, %v242_v39  ;;  %v217_v48 = vmul.f32 0.015625, %v206_v44  ;;  %v218_v49 = vmul.f32 0.015625, %v208_v46 }
  0xc9   : > { %v256_v50 = vsel %vm255_vm2, %v254_v43, %v249_v47 }
  0xca   : > { %v263_v51 = vsel %vm262_vm3, %v261_v41, %v256_v50  ;;  %v268_v52 = vrot.slane %v217_v48, %v267_v37  ;;  %v275_v55 = vrot.slane %v218_v49, %v274_v45 }
  0xcb   : > { %v210_v56 = vpop.xlane.xlu0 %209  ;;  %v212_v57 = vpop.xlane.xlu1 %211 }
  0xcc   : > { %v270_v58 = vsel %vm269_vm4, %v268_v52, %v263_v51  ;;  %v219_v59 = vmul.f32 0.015625, %v210_v56  ;;  %v220_v60 = vmul.f32 0.015625, %v212_v57 }
  0xcd   : > { %v277_v63 = vsel %vm276_vm5, %v275_v55, %v270_v58 }
  0xce   : > { %v282_v61 = vrot.slane %v219_v59, %v281_v53  ;;  %v289_v62 = vrot.slane %v220_v60, %v288_v54 }
  0xd0   : > { %v284_v8 = vsel %vm283_vm6, %v282_v61, %v277_v63 }
  0xd1   : > { %v291_v9 = vsel %vm290_vm7, %v289_v62, %v284_v8 }
  0xd2   : > { %637 = vmatmul.mubr.msk.f32.vlgmr.msra.gmra.mxu0 %vm292_vm8, %v291_v9 }
 0x192   : > { %v361_v11 = vpop.f32.mrf.mxu0 }
 0x193   : > { %v365_v12 = vmax.f32 %v361_v11, 0.0 }
 0x194   : > { %v638_v13 = vpop.f32.mrf.mxu0 }
 0x195   : > { %642 = vmatmul.mubr.msk.f32.vlgmr.msra.gmra.mxu1 %vm367_vm10, %v365_v12 }
 0x255   : > { %v441_v14 = vpop.f32.mrf.mxu1 }
 0x256   : > { %v601_v15 = vmul.f32 -1.442695, %v441_v14 }
 0x257   : > { %v643_v16 = vpop.f32.mrf.mxu1 }
 0x258   : > { %696 = vpow2.f32 %v601_v15 }
 0x265   : > { %v697_v17 = vpop.eup %696 }
 0x266   : > { %v448_v18 = vadd.f32 1.0, %v697_v17 }
 0x268   : > { %698 = vrcp.f32 %v448_v18 }
 0x275   : > { %v699_v21 = vpop.eup %698 }
 0x276   : > { %v454_v22 = vrot.slane %v699_v21, %v453_v20 }
 0x278   : > { %460 = vbcast.lane.b32.xlu1 %v454_v22, 264  ;;  %456 = vbcast.lane.b32.xlu0 %v454_v22, 256 }
 0x27c   : > { %464 = vbcast.lane.b32.xlu1 %v454_v22, 272  ;;  %472 = vbcast.lane.b32.xlu0 %v454_v22, 288 }
 0x280   : > { %468 = vbcast.lane.b32.xlu1 %v454_v22, 280  ;;  %480 = vbcast.lane.b32.xlu0 %v454_v22, 304 }
 0x284   : > { %476 = vbcast.lane.b32.xlu1 %v454_v22, 296 }
 0x288   : > { %484 = vbcast.lane.b32.xlu1 %v454_v22, 312 }
 0x2ea   : > { %v461_v23 = vpop.permute.xlu1 %460  ;;  %v457_v24 = vpop.permute.xlu0 %456 }
 0x2eb   : > { %v487_v25 = vmul.f32 %v461_v23, %v935_v2  ;;  %v486_v26 = vmul.f32 %v457_v24, %v929_v0 }
 0x2ed   : > { %495 = vst [vmem:[%s188_s6 + $0x8] sm:$0xff] %v487_v25  ;;  %494 = vst [vmem:[%s188_s6] sm:$0xff] %v486_v26 }
 0x2ee   : > { %v465_v19 = vpop.permute.xlu1 %464  ;;  %v473_v27 = vpop.permute.xlu0 %472 }
 0x2ef   : > { %v488_v28 = vmul.f32 %v465_v19, %v931_v1  ;;  %v490_v29 = vmul.f32 %v473_v27, %v941_v4 }
 0x2f1   : > { %496 = vst [vmem:[%s188_s6 + $0x10] sm:$0xff] %v488_v28  ;;  %498 = vst [vmem:[%s188_s6 + $0x20] sm:$0xff] %v490_v29 }
 0x2f2   : > { %v469_v30 = vpop.permute.xlu1 %468  ;;  %v481_v31 = vpop.permute.xlu0 %480 }
 0x2f3   : > { %v489_v2 = vmul.f32 %v469_v30, %v937_v3  ;;  %v492_v0 = vmul.f32 %v481_v31, %v947_v6 }
 0x2f5   : > { %497 = vst [vmem:[%s188_s6 + $0x18] sm:$0xff] %v489_v2  ;;  %500 = vst [vmem:[%s188_s6 + $0x30] sm:$0xff] %v492_v0 }
 0x2f6   : > { %v477_v32 = vpop.permute.xlu1 %476 }
 0x2f7   : > { %v491_v33 = vmul.f32 %v477_v32, %v943_v5 }
 0x2f9   : > { %499 = vst [vmem:[%s188_s6 + $0x28] sm:$0xff] %v491_v33 }
 0x2fa   : > { %v485_v1 = vpop.permute.xlu1 %484 }
 0x2fb   : > { %v493_v3 = vmul.f32 %v485_v1, %v949_v7 }
 0x2fd   : > { %501 = vst [vmem:[%s188_s6 + $0x38] sm:$0xff] %v493_v3 }
 0x2fe   : > { %741 = shalt.err (!%p738_p10)
}
 0x2ff   : > { %s742_s28 = scalar_lea.hbm %s1006_s19, 1024  ;;  %s746_s10 = scalar_lea.hbm %s1053_s3, 2048 }
 0x300   : > { %p743_p0 = scmp.ne.s32.totalorder %s1006_s19, %s742_s28  ;;  %p747_p1 = scmp.lt.s32.totalorder %s1006_s19, %s1053_s3 }
 0x301   : > { %p748_p3 = scmp.lt.s32.totalorder %s746_s10, %s742_s28 }
 0x302   : > { %p744_p2 = pnand %p743_p0, %p1062_p12 }
 0x303   : > { %p749_p6 = por %p748_p3, %p747_p1 }
 0x304   : > { %p745_p9 = pneg %p744_p2 }
 0x306   : > { %p750_p11 = pnand %p749_p6, %p745_p9 }
 0x308   : > { %753 = shalt.err (!%p750_p11)
}
 0x309   : > { %s800_s4 = smov 128   ;;  %s801_s6 = smov 8  }
 0x30a   : > { %646 = dma.vmem_to_hbm [thread:$0]  (%p1062_p12), %s1001_s9, 1024, %s1006_s19, %s503_s20, %s800_s4, %s800_s4, %s801_s6  }
 0x30b PF: > { %s531_s7 = sand.u32 1, %s780_s12   ;;  %p1063_p13 = scmp.ne.s32.totalorder %s1059_s25, 0 }
 0x30c   : > { %p1064_p4 = scmp.ge.s32.totalorder %s792_s15, 2  ;;  %s532_s8 = scalar_lea.sflag [#allocation4], %s531_s7 }
 0x30e   : > { %p653_p5 = pnand %p1064_p4, %p1063_p13 }
 0x310   : > { %p654_p7 = pneg %p653_p5 }
 0x312   : > { %775 = dma.done.wait (%p654_p7), %s532_s8, 1024  }
 0x313   : > { %777 = vsyncadd (%p654_p7), %s532_s8, 4294966272  ;;  %p16_p8 = scmp.ge.s32.totalorder %s847_s18, 4   ;;  %s1065_s12 = smov %s784_s13 }
 0x314   : > { %s1066_s13 = smov %s788_s14  ;;  %s1067_s14 = smov %s859_s21 }
 0x315   : > { %s1068_s15 = smov %s847_s18  ;;  %18 = sbr.rel (!%p16_p8) target bundleno = 5 (0x5), region = 77 }
 0x31a   :  { %537 = vsyncpa [#allocation3], 1 }
 0x31b   :  { %539 = vsyncpa [#allocation3 + $0x1], 1 }
 0x31c   :  { %540 = vsyncpa [#allocation4], 1 }
 0x31d   :  { %542 = vsyncpa [#allocation4 + $0x1], 1 }

</bundles_post_ra>
